<compile_context>
chip_gen: v5e
topology: v5e:2x2
jax: 0.10.0
libtpu: 0.0.40
codegen_flags: <defaults>
</compile_context>

<pallas_src>
import jax
import jax.numpy as jnp
from jax import lax
from jax.experimental import pallas as pl
from jax.experimental.pallas import tpu as pltpu


_UNROLL = 8  # unroll factor for the per-row gather / DMA-issue loops


def _vmem_gather_kernel(ids_ref, table_ref, out_ref):
    """Fast path: table resident in VMEM; gather via dynamic vector loads.

    ids_ref   : SMEM scalar-prefetch, (rows_padded,) int32; padding rows = -1.
    table_ref : VMEM (V, E) float32 table (whole-array resident).
    out_ref   : VMEM output block, (row_tile, E) float32.
    """
    row_tile, _ = out_ref.shape
    base = pl.program_id(0) * row_tile

    # One unmasked block-wide zero; real-token rows are overwritten below.
    out_ref[...] = jnp.zeros_like(out_ref)

    def body(r, carry):
        tok = ids_ref[base + r]

        @pl.when(tok >= 0)
        def _():
            out_ref[pl.ds(r, 1), :] = table_ref[pl.ds(tok, 1), :]

        return carry

    lax.fori_loop(0, row_tile, body, jnp.int32(0), unroll=_UNROLL)


def _hbm_gather_kernel(ids_ref, table_ref, out_ref, sem_ref):
    """Large-table path: per-row HBM DMA gather directly into out_ref.

    ids_ref   : SMEM scalar-prefetch, (rows_padded,) int32; padding rows = -1.
    table_ref : HBM ref (memory_space=pl.ANY), (V, E) float32 table.
    out_ref   : VMEM output block, (row_tile, E) float32 (also the DMA target).
    sem_ref   : single DMA semaphore, shape (1,).
    """
    row_tile, _ = out_ref.shape
    base = pl.program_id(0) * row_tile

    # Whole-block zero first (padding rows stay zero); gathered rows are then
    # DMA'd from HBM directly over their slot in out_ref -- no staging buffer,
    # no trailing vector copy.
    out_ref[...] = jnp.zeros_like(out_ref)

    # Phase 1: issue one row DMA per real token; keep them all in flight.
    # Count how many were started (carry) so the drain needs no id re-reads.
    def issue(r, n_started):
        tok = ids_ref[base + r]

        @pl.when(tok >= 0)
        def _():
            pltpu.make_async_copy(
                table_ref.at[pl.ds(tok, 1), :],
                out_ref.at[pl.ds(r, 1), :],
                sem_ref.at[0],
            ).start()

        return n_started + (tok >= 0).astype(jnp.int32)

    n_started = lax.fori_loop(0, row_tile, issue, jnp.int32(0), unroll=_UNROLL)

    # Phase 2: drain.  Invariant: every transfer is exactly one (1, E) f32 row
    # on the same semaphore, so n_started identical waits retire them all (the
    # src/dst index of the dummy descriptor is irrelevant to the wait -- only
    # the byte count matters).
    def drain(_, carry):
        pltpu.make_async_copy(
            table_ref.at[pl.ds(0, 1), :],
            out_ref.at[pl.ds(0, 1), :],
            sem_ref.at[0],
        ).wait()
        return carry

    lax.fori_loop(0, n_started, drain, jnp.int32(0))


def fast_ner_embedding_forward(token_ids_bt, lengths, table, *,
                               row_tile=256,
                               vmem_table_limit_bytes=4 * 1024 * 1024,
                               force_hbm_gather=False):
    """Pallas equivalent of TritonFastNEREmbedding.forward.

    token_ids_bt : int32 [B, T_max]   token ids (sentence-major)
    lengths      : int32 [B]          number of real tokens per sentence
    table        : float32 [V, E]     embedding table (embedding_length == E)

    Returns (lengths, sentence_tensor[B, T_max, E] float32).
    NOTE: PyTorch returns lengths as int64 (torch.long); with default JAX x64
    disabled we return int32, which is semantically equivalent here.
    """
    B, T = token_ids_bt.shape
    V, E = table.shape
    table = table.astype(jnp.float32)
    rows = B * T

    # --- tile size selection -------------------------------------------------
    # Keep the double-buffered output block under ~8 MiB so it fits the scoped
    # VMEM default on every generation (v5e 16 MiB .. v7x 32 MiB of 64 MiB).
    max_rt_vmem = max(8, ((8 * 1024 * 1024) // (2 * E * 4)) // 8 * 8)
    rows8 = ((rows + 7) // 8) * 8
    rt = max(8, (min(row_tile, max_rt_vmem, rows8) // 8) * 8)
    # v7x megacore: prefer >= 2 tiles on the parallel grid axis when possible.
    if rows8 <= rt and rows8 >= 16:
        rt = max(8, ((rows8 // 2 + 7) // 8) * 8)
    n_tiles = (rows + rt - 1) // rt

    # --- id preprocessing ----------------------------------------------------
    # Clamp ids into [0, V) (deterministic behavior for out-of-range ids), then
    # mark padding positions (t >= len[b]) with -1 so the kernel never gathers
    # for them.  Only this tiny id array is padded -- the output is not.
    ids = jnp.clip(token_ids_bt.astype(jnp.int32), 0, V - 1)
    valid = jnp.arange(T, dtype=jnp.int32)[None, :] < lengths.astype(jnp.int32)[:, None]
    flat_ids = jnp.where(valid, ids, -1).reshape(-1)

    rows_padded = n_tiles * rt
    if rows_padded != rows:
        flat_ids = jnp.pad(flat_ids, (0, rows_padded - rows), constant_values=-1)

    # --- path dispatch -------------------------------------------------------
    use_vmem_table = (not force_hbm_gather) and (V * E * 4 <= vmem_table_limit_bytes)
    if use_vmem_table:
        kernel = _vmem_gather_kernel
        table_spec = pl.BlockSpec(memory_space=pltpu.MemorySpace.VMEM)
        scratch_shapes = []
    else:
        kernel = _hbm_gather_kernel
        table_spec = pl.BlockSpec(memory_space=pl.ANY)   # table stays in HBM
        scratch_shapes = [pltpu.SemaphoreType.DMA((1,))]

    out_flat = pl.pallas_call(
        kernel,
        out_shape=jax.ShapeDtypeStruct((rows, E), jnp.float32),
        grid_spec=pltpu.PrefetchScalarGridSpec(
            num_scalar_prefetch=1,                     # flat token ids -> SMEM
            grid=(n_tiles,),
            in_specs=[table_spec],
            out_specs=pl.BlockSpec((rt, E), lambda i, ids: (i, 0)),
            scratch_shapes=scratch_shapes,
        ),
        compiler_params=pltpu.CompilerParams(
            dimension_semantics=("parallel",),         # row tiles independent
        ),
    )(flat_ids, table)

    sentence_tensor = out_flat.reshape(B, T, E)        # copy-free reshape
    return lengths, sentence_tensor


if __name__ == "__main__":
    key = jax.random.PRNGKey(0)
    k_table, k_ids = jax.random.split(key)

    # Small synthetic "flair" setup: 2 sentences, longest has 8 tokens,
    # vocab 64, embedding_length 128.
    B = 2          # number of sentences
    T_MAX = 8      # longest_token_sequence_in_batch
    V = 64         # vocab size of the synthetic embedding
    E = 128        # self.embeddings.embedding_length

    table = jax.random.normal(k_table, (V, E), dtype=jnp.float32)
    token_ids_bt = jax.random.randint(k_ids, (B, T_MAX), 0, V, dtype=jnp.int32)
    lengths = jnp.array([T_MAX, 5], dtype=jnp.int32)   # second sentence padded

    # Pure-JAX reference of the PyTorch forward semantics.
    ref = table[token_ids_bt]                                       # (B, T, E)
    mask = (jnp.arange(T_MAX)[None, :] < lengths[:, None])[..., None]
    ref = jnp.where(mask, ref, 0.0)

    # Fast path: table resident in VMEM.
    out_lens, out_v = fast_ner_embedding_forward(token_ids_bt, lengths, table)
    out_v = jax.block_until_ready(out_v)
    assert out_v.shape == (B, T_MAX, E) and out_v.dtype == jnp.float32
    assert jnp.allclose(out_v, ref, atol=1e-6), "VMEM-table path mismatch"
    assert jnp.array_equal(out_lens, lengths)

    # Large-table path: per-row HBM DMA gather directly into the output block.
    _, out_h = fast_ner_embedding_forward(token_ids_bt, lengths, table,
                                          force_hbm_gather=True)
    out_h = jax.block_until_ready(out_h)
    assert jnp.allclose(out_h, ref, atol=1e-6), "HBM-gather path mismatch"

    print("KERNEL_OK")
</pallas_src>

<mosaic_0001>
module attributes {stable_mosaic.version = 11 : i64} {
  func.func @_vmem_gather_kernel(%arg0: i32, %arg1: memref<16xi32, #tpu.memory_space<smem>>, %arg2: memref<64x128xf32, #tpu.memory_space<vmem>>, %arg3: memref<8x128xf32, #tpu.memory_space<vmem>>) attributes {dimension_semantics = [#tpu.dimension_semantics<parallel>], iteration_bounds = array<i64: 2>, scalar_prefetch = 1 : i64, scratch_operands = 0 : i64, tpu.core_type = #tpu.core_type<tc>, window_params = [{pipeline_mode = #tpu.pipeline_mode<synchronous>, transform_indices = @transform_0, window_bounds = array<i64: 64, 128>}, {transform_indices = @transform_1, window_bounds = array<i64: 8, 128>}]} {
    %c8_i32 = arith.constant 8 : i32
    %0 = arith.muli %arg0, %c8_i32 : i32
    %cst = arith.constant 0.000000e+00 : f32
    %1 = vector.broadcast %cst : f32 to vector<8x128xf32>
    %c0 = arith.constant 0 : index
    %c0_0 = arith.constant 0 : index
    %2 = vector.load %arg3[%c0, %c0_0] : memref<8x128xf32, #tpu.memory_space<vmem>>, vector<8x128xf32>
    tpu.vector_store %arg3[%c0, %c0_0], %1 {strides = array<i32>} : memref<8x128xf32, #tpu.memory_space<vmem>>, vector<8x128xf32>,
    %c0_i32 = arith.constant 0 : i32
    %3 = arith.addi %0, %c0_i32 : i32
    %4 = arith.index_cast %3 : i32 to index
    %5 = memref.load %arg1[%4] : memref<16xi32, #tpu.memory_space<smem>>
    %c0_i32_1 = arith.constant 0 : i32
    %6 = arith.cmpi sge, %5, %c0_i32_1 : i32
    %7 = arith.extui %6 : i1 to i32
    %c0_i32_2 = arith.constant 0 : i32
    %8 = arith.cmpi ne, %7, %c0_i32_2 : i32
    scf.if %8 {
      %51 = arith.index_cast %5 : i32 to index
      %c0_18 = arith.constant 0 : index
      %52 = vector.load %arg2[%51, %c0_18] : memref<64x128xf32, #tpu.memory_space<vmem>>, vector<1x128xf32>
      %53 = arith.index_cast %c0_i32 : i32 to index
      %c0_19 = arith.constant 0 : index
      %54 = vector.load %arg3[%53, %c0_19] : memref<8x128xf32, #tpu.memory_space<vmem>>, vector<1x128xf32>
      tpu.vector_store %arg3[%53, %c0_19], %52 {strides = array<i32>} : memref<8x128xf32, #tpu.memory_space<vmem>>, vector<1x128xf32>,
    } else {
    }
    %c1_i32 = arith.constant 1 : i32
    %9 = arith.addi %0, %c1_i32 : i32
    %10 = arith.index_cast %9 : i32 to index
    %11 = memref.load %arg1[%10] : memref<16xi32, #tpu.memory_space<smem>>
    %c0_i32_3 = arith.constant 0 : i32
    %12 = arith.cmpi sge, %11, %c0_i32_3 : i32
    %13 = arith.extui %12 : i1 to i32
    %c0_i32_4 = arith.constant 0 : i32
    %14 = arith.cmpi ne, %13, %c0_i32_4 : i32
    scf.if %14 {
      %51 = arith.index_cast %11 : i32 to index
      %c0_18 = arith.constant 0 : index
      %52 = vector.load %arg2[%51, %c0_18] : memref<64x128xf32, #tpu.memory_space<vmem>>, vector<1x128xf32>
      %53 = arith.index_cast %c1_i32 : i32 to index
      %c0_19 = arith.constant 0 : index
      %54 = vector.load %arg3[%53, %c0_19] : memref<8x128xf32, #tpu.memory_space<vmem>>, vector<1x128xf32>
      tpu.vector_store %arg3[%53, %c0_19], %52 {strides = array<i32>} : memref<8x128xf32, #tpu.memory_space<vmem>>, vector<1x128xf32>,
    } else {
    }
    %c2_i32 = arith.constant 2 : i32
    %15 = arith.addi %0, %c2_i32 : i32
    %16 = arith.index_cast %15 : i32 to index
    %17 = memref.load %arg1[%16] : memref<16xi32, #tpu.memory_space<smem>>
    %c0_i32_5 = arith.constant 0 : i32
    %18 = arith.cmpi sge, %17, %c0_i32_5 : i32
    %19 = arith.extui %18 : i1 to i32
    %c0_i32_6 = arith.constant 0 : i32
    %20 = arith.cmpi ne, %19, %c0_i32_6 : i32
    scf.if %20 {
      %51 = arith.index_cast %17 : i32 to index
      %c0_18 = arith.constant 0 : index
      %52 = vector.load %arg2[%51, %c0_18] : memref<64x128xf32, #tpu.memory_space<vmem>>, vector<1x128xf32>
      %53 = arith.index_cast %c2_i32 : i32 to index
      %c0_19 = arith.constant 0 : index
      %54 = vector.load %arg3[%53, %c0_19] : memref<8x128xf32, #tpu.memory_space<vmem>>, vector<1x128xf32>
      tpu.vector_store %arg3[%53, %c0_19], %52 {strides = array<i32>} : memref<8x128xf32, #tpu.memory_space<vmem>>, vector<1x128xf32>,
    } else {
    }
    %c3_i32 = arith.constant 3 : i32
    %21 = arith.addi %0, %c3_i32 : i32
    %22 = arith.index_cast %21 : i32 to index
    %23 = memref.load %arg1[%22] : memref<16xi32, #tpu.memory_space<smem>>
    %c0_i32_7 = arith.constant 0 : i32
    %24 = arith.cmpi sge, %23, %c0_i32_7 : i32
    %25 = arith.extui %24 : i1 to i32
    %c0_i32_8 = arith.constant 0 : i32
    %26 = arith.cmpi ne, %25, %c0_i32_8 : i32
    scf.if %26 {
      %51 = arith.index_cast %23 : i32 to index
      %c0_18 = arith.constant 0 : index
      %52 = vector.load %arg2[%51, %c0_18] : memref<64x128xf32, #tpu.memory_space<vmem>>, vector<1x128xf32>
      %53 = arith.index_cast %c3_i32 : i32 to index
      %c0_19 = arith.constant 0 : index
      %54 = vector.load %arg3[%53, %c0_19] : memref<8x128xf32, #tpu.memory_space<vmem>>, vector<1x128xf32>
      tpu.vector_store %arg3[%53, %c0_19], %52 {strides = array<i32>} : memref<8x128xf32, #tpu.memory_space<vmem>>, vector<1x128xf32>,
    } else {
    }
    %c4_i32 = arith.constant 4 : i32
    %27 = arith.addi %0, %c4_i32 : i32
    %28 = arith.index_cast %27 : i32 to index
    %29 = memref.load %arg1[%28] : memref<16xi32, #tpu.memory_space<smem>>
    %c0_i32_9 = arith.constant 0 : i32
    %30 = arith.cmpi sge, %29, %c0_i32_9 : i32
    %31 = arith.extui %30 : i1 to i32
    %c0_i32_10 = arith.constant 0 : i32
    %32 = arith.cmpi ne, %31, %c0_i32_10 : i32
    scf.if %32 {
      %51 = arith.index_cast %29 : i32 to index
      %c0_18 = arith.constant 0 : index
      %52 = vector.load %arg2[%51, %c0_18] : memref<64x128xf32, #tpu.memory_space<vmem>>, vector<1x128xf32>
      %53 = arith.index_cast %c4_i32 : i32 to index
      %c0_19 = arith.constant 0 : index
      %54 = vector.load %arg3[%53, %c0_19] : memref<8x128xf32, #tpu.memory_space<vmem>>, vector<1x128xf32>
      tpu.vector_store %arg3[%53, %c0_19], %52 {strides = array<i32>} : memref<8x128xf32, #tpu.memory_space<vmem>>, vector<1x128xf32>,
    } else {
    }
    %c5_i32 = arith.constant 5 : i32
    %33 = arith.addi %0, %c5_i32 : i32
    %34 = arith.index_cast %33 : i32 to index
    %35 = memref.load %arg1[%34] : memref<16xi32, #tpu.memory_space<smem>>
    %c0_i32_11 = arith.constant 0 : i32
    %36 = arith.cmpi sge, %35, %c0_i32_11 : i32
    %37 = arith.extui %36 : i1 to i32
    %c0_i32_12 = arith.constant 0 : i32
    %38 = arith.cmpi ne, %37, %c0_i32_12 : i32
    scf.if %38 {
      %51 = arith.index_cast %35 : i32 to index
      %c0_18 = arith.constant 0 : index
      %52 = vector.load %arg2[%51, %c0_18] : memref<64x128xf32, #tpu.memory_space<vmem>>, vector<1x128xf32>
      %53 = arith.index_cast %c5_i32 : i32 to index
      %c0_19 = arith.constant 0 : index
      %54 = vector.load %arg3[%53, %c0_19] : memref<8x128xf32, #tpu.memory_space<vmem>>, vector<1x128xf32>
      tpu.vector_store %arg3[%53, %c0_19], %52 {strides = array<i32>} : memref<8x128xf32, #tpu.memory_space<vmem>>, vector<1x128xf32>,
    } else {
    }
    %c6_i32 = arith.constant 6 : i32
    %39 = arith.addi %0, %c6_i32 : i32
    %40 = arith.index_cast %39 : i32 to index
    %41 = memref.load %arg1[%40] : memref<16xi32, #tpu.memory_space<smem>>
    %c0_i32_13 = arith.constant 0 : i32
    %42 = arith.cmpi sge, %41, %c0_i32_13 : i32
    %43 = arith.extui %42 : i1 to i32
    %c0_i32_14 = arith.constant 0 : i32
    %44 = arith.cmpi ne, %43, %c0_i32_14 : i32
    scf.if %44 {
      %51 = arith.index_cast %41 : i32 to index
      %c0_18 = arith.constant 0 : index
      %52 = vector.load %arg2[%51, %c0_18] : memref<64x128xf32, #tpu.memory_space<vmem>>, vector<1x128xf32>
      %53 = arith.index_cast %c6_i32 : i32 to index
      %c0_19 = arith.constant 0 : index
      %54 = vector.load %arg3[%53, %c0_19] : memref<8x128xf32, #tpu.memory_space<vmem>>, vector<1x128xf32>
      tpu.vector_store %arg3[%53, %c0_19], %52 {strides = array<i32>} : memref<8x128xf32, #tpu.memory_space<vmem>>, vector<1x128xf32>,
    } else {
    }
    %c7_i32 = arith.constant 7 : i32
    %45 = arith.addi %0, %c7_i32 : i32
    %46 = arith.index_cast %45 : i32 to index
    %47 = memref.load %arg1[%46] : memref<16xi32, #tpu.memory_space<smem>>
    %c0_i32_15 = arith.constant 0 : i32
    %48 = arith.cmpi sge, %47, %c0_i32_15 : i32
    %49 = arith.extui %48 : i1 to i32
    %c0_i32_16 = arith.constant 0 : i32
    %50 = arith.cmpi ne, %49, %c0_i32_16 : i32
    scf.if %50 {
      %51 = arith.index_cast %47 : i32 to index
      %c0_18 = arith.constant 0 : index
      %52 = vector.load %arg2[%51, %c0_18] : memref<64x128xf32, #tpu.memory_space<vmem>>, vector<1x128xf32>
      %53 = arith.index_cast %c7_i32 : i32 to index
      %c0_19 = arith.constant 0 : index
      %54 = vector.load %arg3[%53, %c0_19] : memref<8x128xf32, #tpu.memory_space<vmem>>, vector<1x128xf32>
      tpu.vector_store %arg3[%53, %c0_19], %52 {strides = array<i32>} : memref<8x128xf32, #tpu.memory_space<vmem>>, vector<1x128xf32>,
    } else {
    }
    %c8_i32_17 = arith.constant 8 : i32
    return
  }
  func.func @transform_0(%arg0: i32, %arg1: memref<16xi32, #tpu.memory_space<smem>>) -> (i32, i32) {
    %c0_i32 = arith.constant 0 : i32
    %c0_i32_0 = arith.constant 0 : i32
    %c0_i32_1 = arith.constant 0 : i32
    return %c0_i32, %c0_i32_0 : i32, i32
  }
  func.func @transform_1(%arg0: i32, %arg1: memref<16xi32, #tpu.memory_space<smem>>) -> (i32, i32) {
    %c0_i32 = arith.constant 0 : i32
    %c0_i32_0 = arith.constant 0 : i32
    return %arg0, %c0_i32 : i32, i32
  }
}

</mosaic_0001>

<bundles_post_ra>
// kernel: tpu_custom_call.1
= control target key start
LH: loop header
LB: loop body
LE: loop exit
PB: predicated region body
PF: predicated region fallthrough
CT: control target
= control target key end

     0   :  { %s462_s12 = smov [#allocation3]   ;;  %s602_s0 = inlined_call_operand.hbm [shape: s32[16], index: 0, kind: input, shape index: {}]   ;;  %s603_s1 = inlined_call_operand.hbm [shape: f32[64,128], index: 1, kind: input, shape index: {}]   ;;  %s604_s2 = inlined_call_operand.hbm [shape: f32[16,128], index: 2, kind: output, shape index: {}]  }
   0x1   :  { %s8_s11 = sshll.u32 %s602_s0, 4  ;;  %s9_s11 = int_to_ptr.hbm [resolvable:$true] %s8_s11 }
   0x2   :  { %11 = dma.hbm_to_smem %s9_s11, 16, %s462_s12, [#allocation2] }
   0x3   :  { %436 = dma.done.wait [#allocation2], 16 }
   0x4   :  { %437 = vsyncadd [#allocation2], 4294967280 }
   0x5   :  { %14 = sfence }
   0x6   :  { %15 = vsyncpa [#allocation5], 0 }
   0x7   :  { %16 = vsyncpa [#allocation6], 0 }
   0x8   :  { %18 = vsyncpa [#allocation6 + $0x1], 0  ;;  %s485_s13 = smov 0   ;;  %s487_s14 = smov 0  }
   0x9   :  { %s489_s15 = smov 0   ;;  %s491_s16 = smov 0  }
   0xa LB: > { %s506_s0 = sadd.s32 4294967295, %s460_s16   ;;  %s277_s17 = sadd.s32 4294967294, %s460_s16   ;;  %s460_s16 = sphi %s491_s16, %s610_s16   ;;  %s456_s15 = sphi %s489_s15, %s609_s15   ;;  %s452_s14 = sphi %s487_s14, %s608_s14   ;;  %s448_s13 = sphi %s485_s13, %s607_s13  }
   0xb   : > { %s510_s18 = sadd.s32 1, %s460_s16   ;;  %s52_s19 = sadd.s32 1, %s456_s15 }
   0xc   : > { %s49_s20 = ssub.s32 %s460_s16, %s510_s18  ;;  %p62_p0 = scmp.ne.s32.totalorder %s456_s15, %s452_s14 }
   0xd   : > { %p50_p1 = scmp.eq.s32.totalorder %s49_s20, 0  ;;  %p63_p2 = scmp.eq.s32.totalorder %s506_s0, 1 }
   0xe   : > { %p68_p3 = scmp.ne.s32.totalorder %s452_s14, %s448_s13  ;;  %p69_p4 = scmp.eq.s32.totalorder %s277_s17, 1 }
   0xf   : > { %s521_s21 = scalar_select %p50_p1, %s456_s15, %s52_s19  }
  0x10   : > { %p523_p5 = por %p63_p2, %p62_p0  ;;  %p527_p6 = por %p69_p4, %p68_p3 }
  0x11   : > { %p278_p7 = scmp.ge.s32.totalorder %s460_s16, 1  ;;  %p76_p8 = scmp.lt.s32.totalorder %s460_s16, 3 }
  0x12   : > { %p310_p9 = scmp.eq.s32.totalorder %s506_s0, 0  ;;  %s87_s26 = sshll.u32 %s603_s1, 4  ;;  %s88_s26 = int_to_ptr.hbm [resolvable:$true] %s87_s26 }
  0x13   : > { %p77_p10 = pnand %p278_p7, %p76_p8  ;;  %s463_s27 = smov [#allocation4]  }
  0x14   : > { %s89_s28 = sshll.u32 %s463_s27, 4  ;;  %s464_s29 = smov 128   ;;  %s90_s28 = int_to_ptr.vmem [resolvable:$true] %s89_s28 }
  0x15   : > { %p302_p11 = pneg %p77_p10  ;;  %s465_s30 = smov 8  }
  0x16   : > { %105 = sbr.rel (%p77_p10) target bundleno = 170 (0xaa), region = 24 }
  0x17   : > { %p303_p12 = pnand %p310_p9, %p302_p11 }
  0x19   : > { %305 = dma.hbm_to_vmem [thread:$0]  (!%p303_p12), %s88_s26, 1024, %s90_s28, [#allocation5], %s464_s29, %s464_s29, %s465_s30  }
  0x1b   : > { %439 = dma.done.wait (%p310_p9), [#allocation5], 1024  }
  0x1c   : > { %441 = vsyncadd (%p310_p9), [#allocation5], 4294966272  ;;  %s544_s3 = sshll.u32 %s506_s0, 3  ;;  %s118_s4 = sand.u32 1, %s452_s14   ;;  %v466_v0 = vmov 0.0  }
  0x1d   : > { %s123_s5 = sld [smem:[#allocation3 + %s544_s3]]  ;;  %s282_s6 = sshll.u32 %s118_s4, 3 }
  0x1e   : > { %s550_s7 = scalar_lea.vmem [#allocation7], %s282_s6 }
  0x1f   : > { %122 = vst [vmem:[%s550_s7] sm:$0xff] %v466_v0 }
  0x23   : > { %p284_p13 = scmp.lt.s32.totalorder %s123_s5, 0 }
  0x24   : > { %s128_s8 = scalar_lea.vmem (!%p284_p13), [#allocation4], %s123_s5 }
  0x25   : > { %127 = sbr.rel (%p284_p13) target bundleno = 44 (0x2c), region = 32 }
  0x2a   : > { %v129_v1 = vld [vmem:[%s128_s8] sm:$0x1] }
  0x2b   : > { %130 = vst [vmem:[%s550_s7] sm:$0x1] %v129_v1 }
  0x2c PF: > { %s131_s9 = sadd.s32 1, %s544_s3 }
  0x2d   : > { %s132_s10 = sld [smem:[#allocation3 + %s131_s9]] }
  0x33   : > { %p285_p0 = scmp.lt.s32.totalorder %s132_s10, 0 }
  0x34   : > { %s137_s11 = scalar_lea.vmem (!%p285_p0), [#allocation4], %s132_s10 }
  0x35   : > { %136 = sbr.rel (%p285_p0) target bundleno = 60 (0x3c), region = 36 }
  0x3a   : > { %v138_v2 = vld [vmem:[%s137_s11] sm:$0x1] }
  0x3b   : > { %139 = vst [vmem:[%s550_s7 + $0x1] sm:$0x1] %v138_v2 }
  0x3c PF: > { %s140_s12 = sadd.s32 2, %s544_s3 }
  0x3d   : > { %s141_s0 = sld [smem:[#allocation3 + %s140_s12]] }
  0x43   : > { %p286_p1 = scmp.lt.s32.totalorder %s141_s0, 0 }
  0x44   : > { %s146_s17 = scalar_lea.vmem (!%p286_p1), [#allocation4], %s141_s0 }
  0x45   : > { %145 = sbr.rel (%p286_p1) target bundleno = 76 (0x4c), region = 40 }
  0x4a   : > { %v147_v3 = vld [vmem:[%s146_s17] sm:$0x1] }
  0x4b   : > { %148 = vst [vmem:[%s550_s7 + $0x2] sm:$0x1] %v147_v3 }
  0x4c PF: > { %s149_s19 = sadd.s32 3, %s544_s3 }
  0x4d   : > { %s150_s20 = sld [smem:[#allocation3 + %s149_s19]] }
  0x53   : > { %p287_p2 = scmp.lt.s32.totalorder %s150_s20, 0 }
  0x54   : > { %s155_s24 = scalar_lea.vmem (!%p287_p2), [#allocation4], %s150_s20 }
  0x55   : > { %154 = sbr.rel (%p287_p2) target bundleno = 92 (0x5c), region = 44 }
  0x5a   : > { %v156_v4 = vld [vmem:[%s155_s24] sm:$0x1] }
  0x5b   : > { %157 = vst [vmem:[%s550_s7 + $0x3] sm:$0x1] %v156_v4 }
  0x5c PF: > { %s158_s25 = sadd.s32 4, %s544_s3 }
  0x5d   : > { %s159_s26 = sld [smem:[#allocation3 + %s158_s25]] }
  0x63   : > { %p288_p3 = scmp.lt.s32.totalorder %s159_s26, 0 }
  0x64   : > { %s164_s27 = scalar_lea.vmem (!%p288_p3), [#allocation4], %s159_s26 }
  0x65   : > { %163 = sbr.rel (%p288_p3) target bundleno = 108 (0x6c), region = 48 }
  0x6a   : > { %v165_v5 = vld [vmem:[%s164_s27] sm:$0x1] }
  0x6b   : > { %166 = vst [vmem:[%s550_s7 + $0x4] sm:$0x1] %v165_v5 }
  0x6c PF: > { %s167_s28 = sadd.s32 5, %s544_s3 }
  0x6d   : > { %s168_s29 = sld [smem:[#allocation3 + %s167_s28]] }
  0x73   : > { %p289_p4 = scmp.lt.s32.totalorder %s168_s29, 0 }
  0x74   : > { %s173_s30 = scalar_lea.vmem (!%p289_p4), [#allocation4], %s168_s29 }
  0x75   : > { %172 = sbr.rel (%p289_p4) target bundleno = 124 (0x7c), region = 52 }
  0x7a   : > { %v174_v6 = vld [vmem:[%s173_s30] sm:$0x1] }
  0x7b   : > { %175 = vst [vmem:[%s550_s7 + $0x5] sm:$0x1] %v174_v6 }
  0x7c PF: > { %s176_s5 = sadd.s32 6, %s544_s3 }
  0x7d   : > { %s177_s6 = sld [smem:[#allocation3 + %s176_s5]] }
  0x83   : > { %p290_p7 = scmp.lt.s32.totalorder %s177_s6, 0 }
  0x84   : > { %s182_s8 = scalar_lea.vmem (!%p290_p7), [#allocation4], %s177_s6 }
  0x85   : > { %181 = sbr.rel (%p290_p7) target bundleno = 140 (0x8c), region = 56 }
  0x8a   : > { %v183_v7 = vld [vmem:[%s182_s8] sm:$0x1] }
  0x8b   : > { %184 = vst [vmem:[%s550_s7 + $0x6] sm:$0x1] %v183_v7 }
  0x8c PF: > { %s185_s9 = sadd.s32 7, %s544_s3 }
  0x8d   : > { %s186_s10 = sld [smem:[#allocation3 + %s185_s9]] }
  0x93   : > { %p291_p8 = scmp.lt.s32.totalorder %s186_s10, 0 }
  0x94   : > { %s191_s11 = scalar_lea.vmem (!%p291_p8), [#allocation4], %s186_s10 }
  0x95   : > { %190 = sbr.rel (%p291_p8) target bundleno = 156 (0x9c), region = 60 }
  0x9a   : > { %v192_v8 = vld [vmem:[%s191_s11] sm:$0x1] }
  0x9b   : > { %193 = vst [vmem:[%s550_s7 + $0x7] sm:$0x1] %v192_v8 }
  0x9c PF: > { %s205_s17 = scalar_lea.hbm %s604_s2, %s544_s3  ;;  %s207_s19 = sshll.u32 %s550_s7, 4  ;;  %s208_s19 = int_to_ptr.vmem [resolvable:$true] %s207_s19 }
  0x9d   : > { %s209_s20 = sshll.u32 %s205_s17, 4  ;;  %s195_s24 = scalar_lea.sflag [#allocation6], %s118_s4  ;;  %s210_s20 = int_to_ptr.hbm [resolvable:$true] %s209_s20 }
  0x9e   : > { %s406_s25 = sshra.s32 %s210_s20, 4  ;;  %s412_s29 = scalar_lea.hbm %s604_s2, 16  ;;  %s407_s25 = int_to_ptr.hbm [resolvable:$true] %s406_s25 }
  0x9f   : > { %s408_s26 = scalar_lea.hbm %s407_s25, 8  ;;  %p413_p12 = scmp.lt.s32.totalorder %s407_s25, %s604_s2 }
  0xa0   : > { %p409_p9 = scmp.ne.s32.totalorder %s407_s25, %s408_s26  ;;  %p414_p13 = scmp.lt.s32.totalorder %s412_s29, %s408_s26 }
  0xa2   : > { %p410_p10 = pnand %p409_p9, %p523_p5  ;;  %p415_p0 = por %p414_p13, %p413_p12 }
  0xa4   : > { %p411_p11 = pneg %p410_p10 }
  0xa6   : > { %p416_p1 = pnand %p415_p0, %p411_p11 }
  0xa8   : > { %419 = shalt.err (!%p416_p1)
}
  0xa9   : > { %300 = dma.vmem_to_hbm [thread:$0]  (%p523_p5), %s208_s19, 128, %s210_s20, %s195_s24  }
  0xaa PF: > { %p312_p2 = scmp.ge.s32.totalorder %s460_s16, 2  ;;  %s221_s3 = sand.u32 1, %s448_s13  }
  0xab   : > { %s222_s4 = scalar_lea.sflag [#allocation6], %s221_s3 }
  0xac   : > { %p307_p3 = pnand %p312_p2, %p527_p6 }
  0xae   : > { %p308_p4 = pneg %p307_p3 }
  0xb0   : > { %443 = dma.done.wait (%p308_p4), %s222_s4, 128  }
  0xb1   : > { %445 = vsyncadd (%p308_p4), %s222_s4, 4294967168  ;;  %p21_p7 = scmp.ge.s32.totalorder %s510_s18, 4   ;;  %s607_s13 = smov %s452_s14 }
  0xb2   : > { %s608_s14 = smov %s456_s15  ;;  %s609_s15 = smov %s521_s21 }
  0xb3   : > { %s610_s16 = smov %s510_s18  ;;  %23 = sbr.rel (!%p21_p7) target bundleno = 10 (0xa), region = 101 }
  0xb8   :  { %228 = vsyncpa [#allocation5], 1 }
  0xb9   :  { %230 = vsyncpa [#allocation5 + $0x1], 1 }
  0xba   :  { %231 = vsyncpa [#allocation6], 1 }
  0xbb   :  { %233 = vsyncpa [#allocation6 + $0x1], 1 }

</bundles_post_ra>
